<compile_context>
chip_gen: v6e
topology: v6e:2x2x1
jax: 0.10.0
libtpu: 0.0.40
codegen_flags: <defaults>
</compile_context>

<pallas_src>
import functools

import jax
import jax.numpy as jnp
from jax.experimental import pallas as pl
from jax.experimental.pallas import tpu as pltpu

LANES = 128
MAX_BLOCK_ROWS = 8192              # (8192, 128) f32 tile = 4 MiB per input
CHUNK_ROWS = 512                   # in-block chunk for the accumulation loop
ALIGN = 8 * LANES                  # flat length alignment for a cheap reshape
VMEM_LIMIT_BYTES = 40 * 1024 * 1024  # 16 MiB of input buffers + headroom


def _num_tensorcores():
    """Best-effort TensorCore-per-device count (perf hint only, never affects
    correctness)."""
    try:
        kind = jax.devices()[0].device_kind.lower()
    except Exception:
        return 1
    if "lite" in kind or "v5e" in kind or "v6e" in kind or "v2" in kind or "v3" in kind:
        return 1                    # single TensorCore per device
    if "v4" in kind or "v5p" in kind or "v5" in kind or "7" in kind:
        return 2                    # megacore (v4/v5p) or v7x (2 TC/chip)
    return 1


def _accum_block(p_ref, t_ref, o_ref, b, *, block_rows, chunk_rows, n_total, masked):
    """Fold one (block_rows, 128) tile into the three (8,128) accumulators."""
    n_chunks = block_rows // chunk_rows
    sub = chunk_rows // 8

    def part(x):
        # (chunk_rows,128) -> (sub,8,128), sum over leading axis: pure VALU
        # vreg adds into one (8,128) accumulator (no cross-lane work).
        return jnp.sum(x.reshape(sub, 8, LANES), axis=0)

    if masked:
        full_rows = n_total // LANES      # static python ints
        rem_lanes = n_total % LANES
        row_in_chunk = jax.lax.broadcasted_iota(jnp.int32, (chunk_rows, LANES), 0)
        lane_ids = jax.lax.broadcasted_iota(jnp.int32, (chunk_rows, LANES), 1)

    def body(ci, carry):
        tp_acc, p_acc, t_acc = carry
        r0 = pl.multiple_of(ci * chunk_rows, chunk_rows)
        x = p_ref[pl.ds(r0, chunk_rows), :].astype(jnp.float32)
        t = t_ref[pl.ds(r0, chunk_rows), :].astype(jnp.float32)
        # sigmoid(x) == 0.5*tanh(0.5*x) + 0.5  (single EUP transcendental)
        p = 0.5 * jnp.tanh(0.5 * x) + 0.5
        if masked:
            # Row-based mask (no element-id int32 overflow): rows strictly
            # inside n pass; the single partial row is lane-masked; padded /
            # garbage rows beyond the array are rejected.
            grow = b * block_rows + r0 + row_in_chunk
            mask = (grow < full_rows) | ((grow == full_rows) & (lane_ids < rem_lanes))
            p = jnp.where(mask, p, 0.0)
            t = jnp.where(mask, t, 0.0)
        return (tp_acc + part(p * t), p_acc + part(p), t_acc + part(t))

    zero = jnp.zeros((8, LANES), jnp.float32)
    tp_acc, p_acc, t_acc = jax.lax.fori_loop(0, n_chunks, body, (zero, zero, zero))

    o_ref[0, 0, :, :] += tp_acc      # -> TP
    o_ref[0, 1, :, :] += p_acc       # -> sum(p)
    o_ref[0, 2, :, :] += t_acc       # -> sum(t)


def _focal_tversky_kernel(p_ref, t_ref, o_ref, *, n_total, block_rows,
                          chunk_rows, blocks_total):
    c = pl.program_id(0)             # core / parallel index
    s = pl.program_id(1)             # reduction step within this core
    steps = pl.num_programs(1)
    b = c * steps + s                # global block index (may overhang)

    @pl.when(s == 0)
    def _init():
        o_ref[...] = jnp.zeros_like(o_ref)

    n_full_blocks = n_total // (block_rows * LANES)   # static

    # Steady-state: full blocks, no masking at all.
    if n_full_blocks > 0:
        @pl.when(b < n_full_blocks)
        def _full():
            _accum_block(p_ref, t_ref, o_ref, b, block_rows=block_rows,
                         chunk_rows=chunk_rows, n_total=n_total, masked=False)

    # At most one ragged block pays for the mask.  Overhang blocks from the
    # uneven core split (b >= blocks_total) skip accumulation entirely.
    if n_full_blocks < blocks_total:
        @pl.when(b == n_full_blocks)
        def _tail():
            _accum_block(p_ref, t_ref, o_ref, b, block_rows=block_rows,
                         chunk_rows=chunk_rows, n_total=n_total, masked=True)


def focal_tversky_loss(preds, targets, alpha=0.5, beta=0.5, gamma=1, smooth=1.0):
    """Matches FocalTverskyLoss(alpha, beta, gamma).forward(preds, targets, smooth)."""
    n = preds.size
    p = preds.reshape(-1)            # no dtype upcast in the wrapper (bf16 OK)
    t = targets.reshape(-1)

    # Reshape onto the 128-wide lane axis.  If n is already a multiple of
    # 8*128 this is free; otherwise pad by < 1024 elements (values are
    # irrelevant -- the kernel masks the tail against the true n).
    pad = (-n) % ALIGN
    if pad:
        p = jnp.pad(p, (0, pad))
        t = jnp.pad(t, (0, pad))
    p2 = p.reshape(-1, LANES)
    t2 = t.reshape(-1, LANES)
    rows = p2.shape[0]               # multiple of 8 by construction

    block_rows = min(MAX_BLOCK_ROWS, rows)
    blocks_total = pl.cdiv(rows, block_rows)

    # In-block chunking (keeps temporaries small / vreg-resident).  For small
    # problems the whole block is a single chunk.
    if block_rows > CHUNK_ROWS and block_rows % CHUNK_ROWS == 0:
        chunk_rows = CHUNK_ROWS
    else:
        chunk_rows = block_rows

    ncores = _num_tensorcores() if blocks_total > 1 else 1
    steps_per_core = pl.cdiv(blocks_total, ncores)

    def in_idx(c, s):
        b = c * steps_per_core + s
        # Clamp overhang blocks to a valid block index; their data is never
        # accumulated (body is gated by pl.when in the kernel).
        return (jnp.minimum(b, blocks_total - 1), 0)

    kernel = functools.partial(
        _focal_tversky_kernel,
        n_total=n, block_rows=block_rows, chunk_rows=chunk_rows,
        blocks_total=blocks_total,
    )

    partials = pl.pallas_call(
        kernel,
        out_shape=jax.ShapeDtypeStruct((ncores, 3, 8, LANES), jnp.float32),
        grid_spec=pltpu.PrefetchScalarGridSpec(
            num_scalar_prefetch=0,
            grid=(ncores, steps_per_core),
            in_specs=[
                pl.BlockSpec((block_rows, LANES), in_idx),
                pl.BlockSpec((block_rows, LANES), in_idx),
            ],
            out_specs=pl.BlockSpec((1, 3, 8, LANES), lambda c, s: (c, 0, 0, 0)),
        ),
        compiler_params=pltpu.CompilerParams(
            dimension_semantics=("parallel", "arbitrary"),
            vmem_limit_bytes=VMEM_LIMIT_BYTES,
        ),
    )(p2, t2)

    # Tiny epilogue in plain JAX: reduce the (ncores, 3, 8, 128) partials and
    # apply the Tversky formula.  FP/FN via algebraic identities.
    sums = jnp.sum(partials, axis=(0, 2, 3))          # (3,)
    TP, sum_p, sum_t = sums[0], sums[1], sums[2]
    FP = sum_p - TP
    FN = sum_t - TP
    tversky = (TP + smooth) / (TP + alpha * FP + beta * FN + smooth)
    # mean over a scalar == identity; clamp guards rounding for non-int gamma.
    return jnp.maximum(0.0, 1.0 - tversky) ** gamma


def _reference(preds, targets, alpha=0.5, beta=0.5, gamma=1, smooth=1.0):
    p = jax.nn.sigmoid(preds.astype(jnp.float32)).reshape(-1)
    t = targets.astype(jnp.float32).reshape(-1)
    TP = jnp.sum(p * t)
    FP = jnp.sum((1.0 - t) * p)
    FN = jnp.sum(t * (1.0 - p))
    tv = (TP + smooth) / (TP + alpha * FP + beta * FN + smooth)
    return (1.0 - tv) ** gamma


if __name__ == "__main__":
    key = jax.random.PRNGKey(0)
    k1, k2, k3, k4 = jax.random.split(key, 4)

    # NCHW, small shapes: batch=2, channels=4, spatial=16 (n divisible by 1024
    # -> zero-pad-free, mask-free path).
    preds = jax.random.normal(k1, (2, 4, 16, 16), dtype=jnp.float32)
    targets = (jax.random.uniform(k2, (2, 4, 16, 16)) > 0.5).astype(jnp.float32)

    loss = focal_tversky_loss(preds, targets, alpha=0.5, beta=0.5, gamma=1, smooth=1.0)
    loss = jax.block_until_ready(loss)
    ref = _reference(preds, targets, alpha=0.5, beta=0.5, gamma=1, smooth=1.0)
    assert jnp.allclose(loss, ref, atol=1e-5, rtol=1e-5), (loss, ref)

    # Ragged case (n not a multiple of 128) exercises the gated tail mask.
    preds_r = jax.random.normal(k3, (2, 3, 17, 15), dtype=jnp.float32)
    targets_r = (jax.random.uniform(k4, (2, 3, 17, 15)) > 0.5).astype(jnp.float32)
    loss_r = focal_tversky_loss(preds_r, targets_r, alpha=0.3, beta=0.7, gamma=2.0)
    loss_r = jax.block_until_ready(loss_r)
    ref_r = _reference(preds_r, targets_r, alpha=0.3, beta=0.7, gamma=2.0)
    assert jnp.allclose(loss_r, ref_r, atol=1e-5, rtol=1e-5), (loss_r, ref_r)

    print("KERNEL_OK")
</pallas_src>

<mosaic_0001>
module attributes {stable_mosaic.version = 11 : i64} {
  func.func @_focal_tversky_kernel(%arg0: i32, %arg1: i32, %arg2: memref<16x128xf32, #tpu.memory_space<vmem>>, %arg3: memref<16x128xf32, #tpu.memory_space<vmem>>, %arg4: memref<1x3x8x128xf32, #tpu.memory_space<vmem>>) attributes {dimension_semantics = [#tpu.dimension_semantics<parallel>, #tpu.dimension_semantics<arbitrary>], iteration_bounds = array<i64: 1, 1>, scalar_prefetch = 0 : i64, scratch_operands = 0 : i64, tpu.core_type = #tpu.core_type<tc>, window_params = [{transform_indices = @transform_0, window_bounds = array<i64: 16, 128>}, {transform_indices = @transform_1, window_bounds = array<i64: 16, 128>}, {transform_indices = @transform_2, window_bounds = array<i64: 1, 3, 8, 128>}]} {
    %c1_i32 = arith.constant 1 : i32
    %0 = arith.muli %arg0, %c1_i32 : i32
    %1 = arith.addi %0, %arg1 : i32
    %c0_i32 = arith.constant 0 : i32
    %2 = arith.cmpi eq, %arg1, %c0_i32 : i32
    %3 = arith.extui %2 : i1 to i32
    %c0_i32_0 = arith.constant 0 : i32
    %4 = arith.cmpi ne, %3, %c0_i32_0 : i32
    scf.if %4 {
      %cst = arith.constant 0.000000e+00 : f32
      %8 = vector.broadcast %cst : f32 to vector<1x3x8x128xf32>
      %c0 = arith.constant 0 : index
      %c0_3 = arith.constant 0 : index
      %c0_4 = arith.constant 0 : index
      %c0_5 = arith.constant 0 : index
      %9 = vector.load %arg4[%c0, %c0_3, %c0_4, %c0_5] : memref<1x3x8x128xf32, #tpu.memory_space<vmem>>, vector<1x3x8x128xf32>
      tpu.vector_store %arg4[%c0, %c0_3, %c0_4, %c0_5], %8 {strides = array<i32>} : memref<1x3x8x128xf32, #tpu.memory_space<vmem>>, vector<1x3x8x128xf32>,
    } else {
    }
    %c1_i32_1 = arith.constant 1 : i32
    %5 = arith.cmpi slt, %1, %c1_i32_1 : i32
    %6 = arith.extui %5 : i1 to i32
    %c0_i32_2 = arith.constant 0 : i32
    %7 = arith.cmpi ne, %6, %c0_i32_2 : i32
    scf.if %7 {
      %cst = arith.constant 0.000000e+00 : f32
      %8 = vector.broadcast %cst : f32 to vector<8x128xf32>
      %c0_i32_3 = arith.constant 0 : i32
      %c16_i32 = arith.constant 16 : i32
      %9 = arith.muli %c0_i32_3, %c16_i32 : i32
      %10 = tpu.assume_multiple %9, 16 : i32
      %11 = arith.index_cast %10 : i32 to index
      %c0 = arith.constant 0 : index
      %12 = vector.load %arg2[%11, %c0] : memref<16x128xf32, #tpu.memory_space<vmem>>, vector<16x128xf32>
      %13 = arith.index_cast %10 : i32 to index
      %c0_4 = arith.constant 0 : index
      %14 = vector.load %arg3[%13, %c0_4] : memref<16x128xf32, #tpu.memory_space<vmem>>, vector<16x128xf32>
      %cst_5 = arith.constant 5.000000e-01 : f32
      %15 = vector.broadcast %cst_5 : f32 to vector<16x128xf32>
      %16 = arith.mulf %15, %12 : vector<16x128xf32>
      %17 = math.tanh %16 : vector<16x128xf32>
      %cst_6 = arith.constant 5.000000e-01 : f32
      %18 = vector.broadcast %cst_6 : f32 to vector<16x128xf32>
      %19 = arith.mulf %18, %17 : vector<16x128xf32>
      %cst_7 = arith.constant 5.000000e-01 : f32
      %20 = vector.broadcast %cst_7 : f32 to vector<16x128xf32>
      %21 = arith.addf %19, %20 : vector<16x128xf32>
      %22 = arith.mulf %21, %14 : vector<16x128xf32>
      %23 = vector.shape_cast %22 : vector<16x128xf32> to vector<2x8x128xf32>
      %cst_8 = arith.constant dense<0.000000e+00> : vector<8x128xf32>
      %24 = vector.multi_reduction <add>, %23, %cst_8 [0] : vector<2x8x128xf32> to vector<8x128xf32>
      %25 = arith.addf %8, %24 : vector<8x128xf32>
      %26 = vector.shape_cast %21 : vector<16x128xf32> to vector<2x8x128xf32>
      %cst_9 = arith.constant dense<0.000000e+00> : vector<8x128xf32>
      %27 = vector.multi_reduction <add>, %26, %cst_9 [0] : vector<2x8x128xf32> to vector<8x128xf32>
      %28 = arith.addf %8, %27 : vector<8x128xf32>
      %29 = vector.shape_cast %14 : vector<16x128xf32> to vector<2x8x128xf32>
      %cst_10 = arith.constant dense<0.000000e+00> : vector<8x128xf32>
      %30 = vector.multi_reduction <add>, %29, %cst_10 [0] : vector<2x8x128xf32> to vector<8x128xf32>
      %31 = arith.addf %8, %30 : vector<8x128xf32>
      %c1_i32_11 = arith.constant 1 : i32
      %c0_12 = arith.constant 0 : index
      %c0_13 = arith.constant 0 : index
      %c0_14 = arith.constant 0 : index
      %c0_15 = arith.constant 0 : index
      %32 = vector.load %arg4[%c0_12, %c0_13, %c0_14, %c0_15] : memref<1x3x8x128xf32, #tpu.memory_space<vmem>>, vector<1x1x8x128xf32>
      %33 = vector.shape_cast %32 : vector<1x1x8x128xf32> to vector<8x128xf32>
      %34 = arith.addf %33, %25 : vector<8x128xf32>
      %c0_16 = arith.constant 0 : index
      %c0_17 = arith.constant 0 : index
      %c0_18 = arith.constant 0 : index
      %c0_19 = arith.constant 0 : index
      %35 = vector.load %arg4[%c0_16, %c0_17, %c0_18, %c0_19] : memref<1x3x8x128xf32, #tpu.memory_space<vmem>>, vector<1x1x8x128xf32>
      %36 = vector.shape_cast %35 : vector<1x1x8x128xf32> to vector<8x128xf32>
      %37 = vector.shape_cast %34 : vector<8x128xf32> to vector<1x1x8x128xf32>
      tpu.vector_store %arg4[%c0_16, %c0_17, %c0_18, %c0_19], %37 {strides = array<i32>} : memref<1x3x8x128xf32, #tpu.memory_space<vmem>>, vector<1x1x8x128xf32>,
      %c0_20 = arith.constant 0 : index
      %c1 = arith.constant 1 : index
      %c0_21 = arith.constant 0 : index
      %c0_22 = arith.constant 0 : index
      %38 = vector.load %arg4[%c0_20, %c1, %c0_21, %c0_22] : memref<1x3x8x128xf32, #tpu.memory_space<vmem>>, vector<1x1x8x128xf32>
      %39 = vector.shape_cast %38 : vector<1x1x8x128xf32> to vector<8x128xf32>
      %40 = arith.addf %39, %28 : vector<8x128xf32>
      %c0_23 = arith.constant 0 : index
      %c1_24 = arith.constant 1 : index
      %c0_25 = arith.constant 0 : index
      %c0_26 = arith.constant 0 : index
      %41 = vector.load %arg4[%c0_23, %c1_24, %c0_25, %c0_26] : memref<1x3x8x128xf32, #tpu.memory_space<vmem>>, vector<1x1x8x128xf32>
      %42 = vector.shape_cast %41 : vector<1x1x8x128xf32> to vector<8x128xf32>
      %43 = vector.shape_cast %40 : vector<8x128xf32> to vector<1x1x8x128xf32>
      tpu.vector_store %arg4[%c0_23, %c1_24, %c0_25, %c0_26], %43 {strides = array<i32>} : memref<1x3x8x128xf32, #tpu.memory_space<vmem>>, vector<1x1x8x128xf32>,
      %c0_27 = arith.constant 0 : index
      %c2 = arith.constant 2 : index
      %c0_28 = arith.constant 0 : index
      %c0_29 = arith.constant 0 : index
      %44 = vector.load %arg4[%c0_27, %c2, %c0_28, %c0_29] : memref<1x3x8x128xf32, #tpu.memory_space<vmem>>, vector<1x1x8x128xf32>
      %45 = vector.shape_cast %44 : vector<1x1x8x128xf32> to vector<8x128xf32>
      %46 = arith.addf %45, %31 : vector<8x128xf32>
      %c0_30 = arith.constant 0 : index
      %c2_31 = arith.constant 2 : index
      %c0_32 = arith.constant 0 : index
      %c0_33 = arith.constant 0 : index
      %47 = vector.load %arg4[%c0_30, %c2_31, %c0_32, %c0_33] : memref<1x3x8x128xf32, #tpu.memory_space<vmem>>, vector<1x1x8x128xf32>
      %48 = vector.shape_cast %47 : vector<1x1x8x128xf32> to vector<8x128xf32>
      %49 = vector.shape_cast %46 : vector<8x128xf32> to vector<1x1x8x128xf32>
      tpu.vector_store %arg4[%c0_30, %c2_31, %c0_32, %c0_33], %49 {strides = array<i32>} : memref<1x3x8x128xf32, #tpu.memory_space<vmem>>, vector<1x1x8x128xf32>,
    } else {
    }
    return
  }
  func.func @transform_0(%arg0: i32, %arg1: i32) -> (i32, i32) {
    %c1_i32 = arith.constant 1 : i32
    %0 = arith.muli %arg0, %c1_i32 : i32
    %1 = arith.addi %0, %arg1 : i32
    %c0_i32 = arith.constant 0 : i32
    %2 = arith.minsi %1, %c0_i32 : i32
    %c0_i32_0 = arith.constant 0 : i32
    %c0_i32_1 = arith.constant 0 : i32
    return %2, %c0_i32_0 : i32, i32
  }
  func.func @transform_1(%arg0: i32, %arg1: i32) -> (i32, i32) {
    %c1_i32 = arith.constant 1 : i32
    %0 = arith.muli %arg0, %c1_i32 : i32
    %1 = arith.addi %0, %arg1 : i32
    %c0_i32 = arith.constant 0 : i32
    %2 = arith.minsi %1, %c0_i32 : i32
    %c0_i32_0 = arith.constant 0 : i32
    %c0_i32_1 = arith.constant 0 : i32
    return %2, %c0_i32_0 : i32, i32
  }
  func.func @transform_2(%arg0: i32, %arg1: i32) -> (i32, i32, i32, i32) {
    %c0_i32 = arith.constant 0 : i32
    %c0_i32_0 = arith.constant 0 : i32
    %c0_i32_1 = arith.constant 0 : i32
    %c0_i32_2 = arith.constant 0 : i32
    return %arg0, %c0_i32, %c0_i32_0, %c0_i32_1 : i32, i32, i32, i32
  }
}

</mosaic_0001>

<bundles_post_ra>
// kernel: tpu_custom_call.1
= control target key start
LH: loop header
LB: loop body
LE: loop exit
PB: predicated region body
PF: predicated region fallthrough
CT: control target
= control target key end

     0   :  { %7 = vsyncpa [#allocation3], 0  ;;  %s239_s0 = inlined_call_operand.hbm [shape: f32[16,128], index: 0, kind: input, shape index: {}]   ;;  %s240_s1 = inlined_call_operand.hbm [shape: f32[16,128], index: 1, kind: input, shape index: {}]   ;;  %s241_s2 = inlined_call_operand.hbm [shape: f32[1,3,8,128], index: 2, kind: output, shape index: {}]  }
   0x1   :  { %8 = vsyncpa [#allocation6], 0 }
   0x2   :  { %9 = vsyncpa [#allocation4], 0  ;;  %s201_s9 = smov [#allocation2]  }
   0x3   :  { %s21_s10 = sshll.u32 %s201_s9, 4  ;;  %s22_s10 = int_to_ptr.vmem [resolvable:$true] %s21_s10 }
   0x4   :  { %s143_s11 = scalar_lea.vmem %s22_s10, 256  ;;  %p148_p1 = scmp.lt.s32.totalorder %s22_s10, %s22_s10 }
   0x5   :  { %p144_p0 = scmp.ne.s32.totalorder %s22_s10, %s143_s11  ;;  %p149_p2 = scmp.lt.s32.totalorder %s143_s11, %s143_s11 }
   0x7   :  { %p150_p3 = por %p149_p2, %p148_p1 }
   0x9   :  { %p151_p4 = pnand %p150_p3, %p144_p0 }
   0xb   :  { %154 = shalt.err (!%p151_p4)
}
   0xc   :  { %s202_s12 = smov 128   ;;  %s203_s13 = smov 8  }
   0xd   :  { %27 = dma.hbm_to_vmem [thread:$0]  %s239_s0, 256, %s22_s10, [#allocation3], %s202_s12, %s202_s12, %s203_s13  }
   0xe   :  { %s204_s16 = smov [#allocation5]  }
   0xf   :  { %s39_s17 = sshll.u32 %s204_s16, 4  ;;  %s40_s17 = int_to_ptr.vmem [resolvable:$true] %s39_s17 }
  0x10   :  { %s163_s18 = scalar_lea.vmem %s40_s17, 256  ;;  %p168_p6 = scmp.lt.s32.totalorder %s40_s17, %s40_s17 }
  0x11   :  { %p164_p5 = scmp.ne.s32.totalorder %s40_s17, %s163_s18  ;;  %p169_p7 = scmp.lt.s32.totalorder %s163_s18, %s163_s18 }
  0x13   :  { %p170_p8 = por %p169_p7, %p168_p6 }
  0x15   :  { %p171_p9 = pnand %p170_p8, %p164_p5 }
  0x17   :  { %174 = shalt.err (!%p171_p9)
}
  0x18   :  { %45 = dma.hbm_to_vmem [thread:$0]  %s240_s1, 256, %s40_s17, [#allocation6], %s202_s12, %s202_s12, %s203_s13  }
  0x19   :  { %195 = dma.done.wait [#allocation3], 256  }
  0x1a   :  { %196 = vsyncadd [#allocation3], 4294967040 }
  0x1b   :  { %197 = dma.done.wait [#allocation6], 256  }
  0x1c   :  { %198 = vsyncadd [#allocation6], 4294967040  ;;  %v72_v0 = vld [vmem:[#allocation2] sm:$0xff]  ;;  %v73_v1 = vld [vmem:[#allocation2 + $0x8] sm:$0xff]  ;;  %s205_s0 = smov [#allocation7]  }
  0x1d   :  { %v74_v2 = vld [vmem:[#allocation5] sm:$0xff]  ;;  %v75_v3 = vld [vmem:[#allocation5 + $0x8] sm:$0xff]  ;;  %v76_v4 = vmul.f32 0.5, %v72_v0  ;;  %v77_v5 = vmul.f32 0.5, %v73_v1  ;;  %s108_s1 = sshll.u32 %s205_s0, 4  ;;  %s109_s1 = int_to_ptr.vmem [resolvable:$true] %s108_s1 }
  0x1e   :  { %v90_v6 = vadd.f32 %v75_v3, %v74_v2  ;;  %s175_s21 = scalar_lea.vmem %s109_s1, 384  ;;  %p180_p11 = scmp.lt.s32.totalorder %s109_s1, %s109_s1 }
  0x1f   :  { %131 = vtanh.f32 %v76_v4  ;;  %p176_p10 = scmp.ne.s32.totalorder %s109_s1, %s175_s21  ;;  %p181_p12 = scmp.lt.s32.totalorder %s175_s21, %s175_s21 }
  0x20   :  { %133 = vtanh.f32 %v77_v5  ;;  %102 = vst [vmem:[#allocation7 + $0x10] sm:$0xff] %v90_v6 }
  0x21   :  { %p182_p13 = por %p181_p12, %p180_p11 }
  0x23   :  { %p183_p0 = pnand %p182_p13, %p176_p10 }
  0x2c   :  { %v132_v7 = vpop.eup %131 }
  0x2d   :  { %v134_v8 = vpop.eup %133  ;;  %v80_v9 = vmul.f32 0.5, %v132_v7 }
  0x2e   :  { %v81_v10 = vmul.f32 0.5, %v134_v8 }
  0x2f   :  { %v82_v11 = vadd.f32 0.5, %v80_v9 }
  0x30   :  { %v83_v12 = vadd.f32 0.5, %v81_v10 }
  0x31   :  { %v84_v13 = vmul.f32 %v82_v11, %v74_v2 }
  0x32   :  { %v85_v14 = vmul.f32 %v83_v12, %v75_v3  ;;  %v88_v15 = vadd.f32 %v83_v12, %v82_v11 }
  0x34   :  { %v86_v16 = vadd.f32 %v85_v14, %v84_v13  ;;  %98 = vst [vmem:[#allocation7 + $0x8] sm:$0xff] %v88_v15 }
  0x36   :  { %94 = vst [vmem:[#allocation7] sm:$0xff] %v86_v16 }
  0x37   :  { %186 = shalt.err (!%p183_p0)
}
  0x38   :  { %114 = dma.vmem_to_hbm [thread:$0]  %s109_s1, 384, %s241_s2, [#allocation4], %s202_s12, %s202_s12, %s203_s13  }
  0x39   :  { %199 = dma.done.wait [#allocation4], 384  }
  0x3a   :  { %200 = vsyncadd [#allocation4], 4294966912 }
  0x3b   :  { %118 = vsyncpa [#allocation3], 1 }
  0x3c   :  { %119 = vsyncpa [#allocation6], 1 }
  0x3d   :  { %120 = vsyncpa [#allocation4], 1 }

</bundles_post_ra>
